<compile_context>
chip_gen: v6e
topology: v6e:2x2x1
jax: 0.10.0
libtpu: 0.0.40
codegen_flags: <defaults>
</compile_context>

<pallas_src>
import functools

import jax
import jax.numpy as jnp
from jax.experimental import pallas as pl
from jax.experimental.pallas import tpu as pltpu


def _round_up(x: int, m: int) -> int:
    return ((x + m - 1) // m) * m


def _tpu_cores_and_vmem():
    """Best-effort (num TensorCores per chip, physical VMEM bytes)."""
    kind = ""
    try:
        kind = jax.devices()[0].device_kind.lower()
    except Exception:  # pragma: no cover - defensive
        pass
    if "v7" in kind:
        return 2, 64 * 1024 * 1024     # v7x: 2 TCs, 64 MiB VMEM per TC
    return 1, 128 * 1024 * 1024        # v5e / v6e: 1 TC, 128 MiB VMEM


def _coref_kernel(x_ref, wt_ref, b_ref, clf_ref, coref_ref, *, use_bf16):
    # x_ref:     [Bt, Np, Hp]  gathered + zero-padded valid-mention reprs
    # wt_ref:    [Hp, Hp]      linear weight, pre-transposed (W^T), zero-padded
    # b_ref:     [1,  Hp]      linear bias (f32), zero-padded
    # clf_ref:   [Bt, Np, Np]  cosine-similarity matrices (output)
    # coref_ref: [Bt, Np, Hp]  projected mention representations (output)
    bt, np_, hp = x_ref.shape
    prec = None if use_bf16 else jax.lax.Precision.HIGHEST

    # Projection as ONE (Bt*Np, Hp) x (Hp, Hp) matmul over all rows (fills the
    # MXU instead of Bt tiny matmuls).  Leading-dim collapse is layout-free
    # (Np is a multiple of the sublane granule for the operand dtype).
    x2d = x_ref[...].reshape(bt * np_, hp)
    proj = jnp.dot(x2d, wt_ref[...],
                   preferred_element_type=jnp.float32, precision=prec)
    coref = (proj + b_ref[...]).reshape(bt, np_, hp)        # f32 [Bt, Np, Hp]

    # Store coref right away: its writeback DMA overlaps the Gram matmul and
    # its f32 live range ends earlier (VMEM/vreg pressure, v7x 64 MiB budget).
    coref_ref[...] = coref.astype(coref_ref.dtype)

    # L2 normalization along the hidden dim: rsqrt (EUP, own VLIW slot) * mul
    # instead of sqrt + divide on the VALU.  The tiny floor guards zero-padded
    # rows (and degenerate zero-norm rows) against 0/0 -> NaN; true norms below
    # ~1e-15 are clamped (documented divergence from the reference).
    sq = jnp.sum(coref * coref, axis=-1, keepdims=True)     # [Bt, Np, 1]
    normed = coref * jax.lax.rsqrt(jnp.maximum(sq, 1e-30))
    if use_bf16:
        normed = normed.astype(jnp.bfloat16)                # single-pass MXU

    # Cosine similarity (Gram): contract the LAST dim of both operands so the
    # MXU is fed directly -- no explicit .T / XLU relayout.  f32 accumulation.
    # TODO(synk): at large N, tile the Gram over a 2-D (i, j) row grid and
    # exploit symmetry (compute only j >= i blocks, mirror via XLU transpose).
    clf = jnp.einsum("bnh,bmh->bnm", normed, normed,
                     preferred_element_type=jnp.float32, precision=prec)
    clf_ref[...] = clf.astype(clf_ref.dtype)


def cosine_similarity_coref_forward(mention_reprs, valid_mentions, weight, bias,
                                    *, use_bf16_matmul=True):
    """
    mention_reprs:  [B, M, R] float32, R >= H
    valid_mentions: [B, N] int32 indices into the M axis
    weight:         [H, H] float32 (nn.Linear weight; y = x @ weight.T + bias)
    bias:           [H] float32
    use_bf16_matmul: bf16 MXU operands with f32 accumulation (fast path).
                     False -> f32 operands with Precision.HIGHEST (exact path).
    Returns dict with 'coref_clf' [B, N, N] and 'valid_mention_coref_reprs' [B, N, H].
    """
    H = weight.shape[0]
    B, N = valid_mentions.shape

    # batch_index gather + repr-size slice: plain-JAX glue feeding the kernel.
    # TODO(synk): move this gather into the kernel (scalar-prefetched
    # valid_mentions + pl.Element row gather / manual DMA from an ANY-space
    # mention_reprs) to remove the extra HBM round trip at production sizes.
    gathered = jnp.take_along_axis(
        mention_reprs, valid_mentions[:, :, None], axis=1)      # [B, N, R]
    x = gathered[:, :, :H]                                      # [B, N, H]

    in_dtype = jnp.bfloat16 if use_bf16_matmul else jnp.float32
    in_bytes = 2 if use_bf16_matmul else 4

    # Padding: hidden dim lane-dense (128) so projection/coref stores are
    # unmasked full-lane vst and MXU tiles are full; N only sublane-aligned
    # (16 for bf16 packing, 8 for f32) so the Np^2 Gram work stays ~N^2.
    Hp = _round_up(H, 128)
    Np = _round_up(N, 16 if use_bf16_matmul else 8)

    num_tc, phys_vmem = _tpu_cores_and_vmem()

    # Batch-block heuristic: big blocks amortize the ~0.35us/step pipeline
    # overhead and fill the MXU.  On 2-TC chips (v7x) keep grid extent >= 2 so
    # both TensorCores get work; single-TC chips (v5e/v6e) take the biggest
    # block that fits VMEM.
    rows_target = 2048 if num_tc == 1 else 1024
    Bt = max(1, min(B, rows_target // max(Np, 1)))
    if num_tc >= 2 and B >= 2:
        Bt = min(Bt, max(1, B // 2))
    # TODO(synk): when B == 1 (or num_blocks == 1) on a 2-TC chip, add a second
    # "parallel" grid axis over Np row tiles so both TensorCores stay busy.

    # VMEM footprint: double-buffered pipelined blocks + in-kernel f32
    # intermediates.  Shrink Bt until it fits under a generation-aware cap
    # (v7x has only 64 MiB physical VMEM per TC).
    def footprint(bt):
        blocks = (2 * bt * Np * Hp * in_bytes      # x input (double-buffered)
                  + 2 * Hp * Hp * in_bytes         # W^T (conservatively x2)
                  + 2 * Hp * 4                     # bias
                  + 2 * bt * Np * Np * 4           # clf output block
                  + 2 * bt * Np * Hp * 4)          # coref output block
        inter = (bt * Np * Hp * in_bytes           # x2d reshape copy
                 + bt * Np * Hp * 4                # coref (f32)
                 + bt * Np * Hp * in_bytes         # normed
                 + bt * Np * Np * 4)               # clf (f32)
        return blocks + inter

    vmem_cap = (40 * 1024 * 1024 if phys_vmem <= 64 * 1024 * 1024
                else 80 * 1024 * 1024)
    while Bt > 1 and footprint(Bt) > vmem_cap:
        Bt = max(1, Bt // 2)
    vmem_limit = int(min(vmem_cap, max(footprint(Bt) * 2, 32 * 1024 * 1024)))

    Bp = _round_up(B, Bt)
    num_blocks = Bp // Bt

    x_pad = jnp.pad(x.astype(in_dtype), ((0, Bp - B), (0, Np - N), (0, Hp - H)))
    w_t = jnp.pad(jnp.transpose(weight).astype(in_dtype),
                  ((0, Hp - H), (0, Hp - H)))                   # [Hp, Hp]
    b2d = jnp.pad(bias.astype(jnp.float32).reshape(1, H),
                  ((0, 0), (0, Hp - H)))                        # [1, Hp]

    flops = 2 * Bp * Np * Hp * Hp + 2 * Bp * Np * Np * Hp
    bytes_accessed = (in_bytes * (Bp * Np * Hp + Hp * Hp)
                      + 4 * (Hp + Bp * Np * Np + Bp * Np * Hp))

    kernel = functools.partial(_coref_kernel, use_bf16=use_bf16_matmul)

    clf_pad, coref_pad = pl.pallas_call(
        kernel,
        out_shape=(
            jax.ShapeDtypeStruct((Bp, Np, Np), jnp.float32),
            jax.ShapeDtypeStruct((Bp, Np, Hp), jnp.float32),
        ),
        grid_spec=pltpu.PrefetchScalarGridSpec(
            num_scalar_prefetch=0,
            grid=(num_blocks,),
            in_specs=[
                pl.BlockSpec((Bt, Np, Hp), lambda b: (b, 0, 0)),
                pl.BlockSpec((Hp, Hp), lambda b: (0, 0)),
                pl.BlockSpec((1, Hp), lambda b: (0, 0)),
            ],
            out_specs=[
                pl.BlockSpec((Bt, Np, Np), lambda b: (b, 0, 0)),
                pl.BlockSpec((Bt, Np, Hp), lambda b: (b, 0, 0)),
            ],
        ),
        compiler_params=pltpu.CompilerParams(
            dimension_semantics=("parallel",),
            vmem_limit_bytes=vmem_limit,
        ),
        cost_estimate=pl.CostEstimate(
            flops=flops,
            transcendentals=Bp * Np,
            bytes_accessed=bytes_accessed,
        ),
    )(x_pad, w_t, b2d)

    clf = clf_pad[:B, :N, :N]
    coref = coref_pad[:B, :N, :H]
    return {"coref_clf": clf, "valid_mention_coref_reprs": coref}


def _reference_forward(mention_reprs, valid_mentions, weight, bias):
    """Pure-JAX reference (HIGHEST precision so it is a true f32 baseline)."""
    H = weight.shape[0]
    hi = jax.lax.Precision.HIGHEST
    gathered = jnp.take_along_axis(mention_reprs, valid_mentions[:, :, None], axis=1)
    x = gathered[:, :, :H]
    coref = jnp.einsum("bnh,kh->bnk", x, weight, precision=hi) + bias
    nrm = jnp.linalg.norm(coref, axis=2)[:, :, None]
    normed = coref / nrm
    clf = jnp.einsum("bnk,bmk->bnm", normed, normed, precision=hi)
    return clf, coref


if __name__ == "__main__":
    key = jax.random.PRNGKey(0)
    B, M, N, H = 2, 16, 8, 32

    k1, k2, k3, k4 = jax.random.split(key, 4)
    mention_reprs = jax.random.normal(k1, (B, M, H), dtype=jnp.float32)
    valid_mentions = jax.random.randint(k2, (B, N), 0, M, dtype=jnp.int32)
    # Deterministic nn.Linear-style params (synthetic, not from a checkpoint).
    weight = jax.random.normal(k3, (H, H), dtype=jnp.float32) * (1.0 / jnp.sqrt(H))
    bias = jax.random.normal(k4, (H,), dtype=jnp.float32) * 0.01

    ref_clf, ref_coref = _reference_forward(mention_reprs, valid_mentions, weight, bias)

    # Fast path: bf16 MXU operands, f32 accumulation (default).
    out = cosine_similarity_coref_forward(mention_reprs, valid_mentions, weight, bias)
    clf = jax.block_until_ready(out["coref_clf"])
    coref = jax.block_until_ready(out["valid_mention_coref_reprs"])
    assert clf.shape == (B, N, N) and coref.shape == (B, N, H)
    assert jnp.allclose(clf, ref_clf, atol=3e-2, rtol=3e-2)
    assert jnp.allclose(coref, ref_coref, atol=3e-2, rtol=3e-2)

    # Exact path: f32 operands with explicit HIGHEST precision.
    out_f32 = cosine_similarity_coref_forward(
        mention_reprs, valid_mentions, weight, bias, use_bf16_matmul=False)
    clf_f32 = jax.block_until_ready(out_f32["coref_clf"])
    coref_f32 = jax.block_until_ready(out_f32["valid_mention_coref_reprs"])
    assert jnp.allclose(clf_f32, ref_clf, atol=1e-4, rtol=1e-4)
    assert jnp.allclose(coref_f32, ref_coref, atol=1e-4, rtol=1e-4)

    print("KERNEL_OK")
</pallas_src>

<mosaic_0001>
module attributes {stable_mosaic.version = 11 : i64} {
  func.func @_coref_kernel(%arg0: i32, %arg1: memref<2x16x128xbf16, #tpu.memory_space<vmem>>, %arg2: memref<128x128xbf16, #tpu.memory_space<vmem>>, %arg3: memref<1x128xf32, #tpu.memory_space<vmem>>, %arg4: memref<2x16x16xf32, #tpu.memory_space<vmem>>, %arg5: memref<2x16x128xf32, #tpu.memory_space<vmem>>) attributes {dimension_semantics = [#tpu.dimension_semantics<parallel>], iteration_bounds = array<i64: 1>, scalar_prefetch = 0 : i64, scratch_operands = 0 : i64, tpu.core_type = #tpu.core_type<tc>, window_params = [{transform_indices = @transform_0, window_bounds = array<i64: 2, 16, 128>}, {pipeline_mode = #tpu.pipeline_mode<synchronous>, transform_indices = @transform_1, window_bounds = array<i64: 128, 128>}, {pipeline_mode = #tpu.pipeline_mode<synchronous>, transform_indices = @transform_2, window_bounds = array<i64: 1, 128>}, {transform_indices = @transform_3, window_bounds = array<i64: 2, 16, 16>}, {transform_indices = @transform_4, window_bounds = array<i64: 2, 16, 128>}]} {
    %c0 = arith.constant 0 : index
    %c0_0 = arith.constant 0 : index
    %c0_1 = arith.constant 0 : index
    %0 = vector.load %arg1[%c0, %c0_0, %c0_1] : memref<2x16x128xbf16, #tpu.memory_space<vmem>>, vector<2x16x128xbf16>
    %1 = vector.shape_cast %0 : vector<2x16x128xbf16> to vector<32x128xbf16>
    %c0_2 = arith.constant 0 : index
    %c0_3 = arith.constant 0 : index
    %2 = vector.load %arg2[%c0_2, %c0_3] : memref<128x128xbf16, #tpu.memory_space<vmem>>, vector<128x128xbf16>
    %cst = arith.constant dense<0.000000e+00> : vector<32x128xf32>
    %3 = tpu.matmul %1, %2, %cst {dimension_numbers = #tpu.dot_dimension_numbers<[1], [0], [0], [1], [0, 0, 1, 1], [], []>} : vector<32x128xbf16>, vector<128x128xbf16>, vector<32x128xf32> -> vector<32x128xf32>
    %c0_4 = arith.constant 0 : index
    %c0_5 = arith.constant 0 : index
    %4 = vector.load %arg3[%c0_4, %c0_5] : memref<1x128xf32, #tpu.memory_space<vmem>>, vector<1x128xf32>
    %5 = vector.broadcast %4 : vector<1x128xf32> to vector<32x128xf32>
    %6 = arith.addf %3, %5 : vector<32x128xf32>
    %7 = vector.shape_cast %6 : vector<32x128xf32> to vector<2x16x128xf32>
    %c0_6 = arith.constant 0 : index
    %c0_7 = arith.constant 0 : index
    %c0_8 = arith.constant 0 : index
    %8 = vector.load %arg5[%c0_6, %c0_7, %c0_8] : memref<2x16x128xf32, #tpu.memory_space<vmem>>, vector<2x16x128xf32>
    tpu.vector_store %arg5[%c0_6, %c0_7, %c0_8], %7 {strides = array<i32>} : memref<2x16x128xf32, #tpu.memory_space<vmem>>, vector<2x16x128xf32>,
    %9 = arith.mulf %7, %7 : vector<2x16x128xf32>
    %cst_9 = arith.constant dense<0.000000e+00> : vector<2x16xf32>
    %10 = vector.multi_reduction <add>, %9, %cst_9 [2] : vector<2x16x128xf32> to vector<2x16xf32>
    %11 = vector.shape_cast %10 : vector<2x16xf32> to vector<2x16x1xf32>
    %cst_10 = arith.constant 1.000000e-30 : f32
    %12 = vector.broadcast %cst_10 : f32 to vector<2x16x1xf32>
    %13 = arith.maximumf %11, %12 : vector<2x16x1xf32>
    %14 = math.rsqrt %13 : vector<2x16x1xf32>
    %15 = vector.broadcast %14 : vector<2x16x1xf32> to vector<2x16x128xf32>
    %16 = arith.mulf %7, %15 : vector<2x16x128xf32>
    %17 = arith.truncf %16 : vector<2x16x128xf32> to vector<2x16x128xbf16>
    "tpu.trace_start"() <{level = 10 : i32, message = "bnh,bmh->bnm"}> : () -> ()
    %cst_11 = arith.constant dense<0.000000e+00> : vector<2x16x16xf32>
    %18 = tpu.matmul %17, %17, %cst_11 {dimension_numbers = #tpu.dot_dimension_numbers<[2], [2], [1], [1], [0, 0, 0, 1, 1, 1], [0], [0]>} : vector<2x16x128xbf16>, vector<2x16x128xbf16>, vector<2x16x16xf32> -> vector<2x16x16xf32>
    "tpu.trace_stop"() : () -> ()
    %c0_12 = arith.constant 0 : index
    %c0_13 = arith.constant 0 : index
    %c0_14 = arith.constant 0 : index
    %19 = vector.load %arg4[%c0_12, %c0_13, %c0_14] : memref<2x16x16xf32, #tpu.memory_space<vmem>>, vector<2x16x16xf32>
    tpu.vector_store %arg4[%c0_12, %c0_13, %c0_14], %18 {strides = array<i32>} : memref<2x16x16xf32, #tpu.memory_space<vmem>>, vector<2x16x16xf32>,
    return
  }
  func.func @transform_0(%arg0: i32) -> (i32, i32, i32) {
    %c0_i32 = arith.constant 0 : i32
    %c0_i32_0 = arith.constant 0 : i32
    %c0_i32_1 = arith.constant 0 : i32
    return %arg0, %c0_i32, %c0_i32_0 : i32, i32, i32
  }
  func.func @transform_1(%arg0: i32) -> (i32, i32) {
    %c0_i32 = arith.constant 0 : i32
    %c0_i32_0 = arith.constant 0 : i32
    %c0_i32_1 = arith.constant 0 : i32
    return %c0_i32, %c0_i32_0 : i32, i32
  }
  func.func @transform_2(%arg0: i32) -> (i32, i32) {
    %c0_i32 = arith.constant 0 : i32
    %c0_i32_0 = arith.constant 0 : i32
    %c0_i32_1 = arith.constant 0 : i32
    return %c0_i32, %c0_i32_0 : i32, i32
  }
  func.func @transform_3(%arg0: i32) -> (i32, i32, i32) {
    %c0_i32 = arith.constant 0 : i32
    %c0_i32_0 = arith.constant 0 : i32
    %c0_i32_1 = arith.constant 0 : i32
    return %arg0, %c0_i32, %c0_i32_0 : i32, i32, i32
  }
  func.func @transform_4(%arg0: i32) -> (i32, i32, i32) {
    %c0_i32 = arith.constant 0 : i32
    %c0_i32_0 = arith.constant 0 : i32
    %c0_i32_1 = arith.constant 0 : i32
    return %arg0, %c0_i32, %c0_i32_0 : i32, i32, i32
  }
}

</mosaic_0001>

<bundles_post_ra>
// kernel: tpu_custom_call.1
= control target key start
LH: loop header
LB: loop body
LE: loop exit
PB: predicated region body
PF: predicated region fallthrough
CT: control target
= control target key end

     0   :  { %10 = vsyncpa [#allocation3], 0  ;;  %s559_s0 = inlined_call_operand.hbm [shape: bf16[2,16,128], index: 0, kind: input, shape index: {}]   ;;  %s560_s1 = inlined_call_operand.hbm [shape: bf16[128,128], index: 1, kind: input, shape index: {}]   ;;  %s561_s2 = inlined_call_operand.vmem [shape: f32[1,128], index: 2, kind: input, shape index: {}]   ;;  %s562_s3 = inlined_call_operand.hbm [shape: f32[2,16,16], index: 3, kind: output, shape index: {0}]   ;;  %s563_s4 = inlined_call_operand.hbm [shape: f32[2,16,128], index: 4, kind: output, shape index: {1}]  }
   0x1   :  { %11 = vsyncpa [#allocation6], 0 }
   0x2   :  { %12 = vsyncpa [#allocation4], 0 }
   0x3   :  { %13 = vsyncpa [#allocation9], 0  ;;  %s507_s15 = smov [#allocation2]  }
   0x4   :  { %s19_s16 = sshll.u32 %s507_s15, 4  ;;  %s20_s16 = int_to_ptr.vmem [resolvable:$true] %s19_s16 }
   0x5   :  { %s427_s17 = scalar_lea.vmem %s20_s16, 256  ;;  %p432_p1 = scmp.lt.s32.totalorder %s20_s16, %s20_s16 }
   0x6   :  { %p428_p0 = scmp.ne.s32.totalorder %s20_s16, %s427_s17  ;;  %p433_p2 = scmp.lt.s32.totalorder %s427_s17, %s427_s17 }
   0x8   :  { %p434_p3 = por %p433_p2, %p432_p1 }
   0xa   :  { %p435_p4 = pnand %p434_p3, %p428_p0 }
   0xc   :  { %438 = shalt.err (!%p435_p4)
}
   0xd   :  { %s508_s18 = smov 64   ;;  %s509_s19 = smov 4  }
   0xe   :  { %25 = dma.hbm_to_vmem [thread:$0]  %s559_s0, 256, %s20_s16, [#allocation3], %s508_s18, %s508_s18, %s509_s19  }
   0xf   :  { %s510_s22 = smov [#allocation5]  }
  0x10   :  { %s31_s23 = sshll.u32 %s510_s22, 4  ;;  %s32_s23 = int_to_ptr.vmem [resolvable:$true] %s31_s23 }
  0x11   :  { %s447_s24 = scalar_lea.vmem %s32_s23, 1024  ;;  %p452_p6 = scmp.lt.s32.totalorder %s32_s23, %s32_s23 }
  0x12   :  { %p448_p5 = scmp.ne.s32.totalorder %s32_s23, %s447_s24  ;;  %p453_p7 = scmp.lt.s32.totalorder %s447_s24, %s447_s24 }
  0x14   :  { %p454_p8 = por %p453_p7, %p452_p6 }
  0x16   :  { %p455_p9 = pnand %p454_p8, %p448_p5 }
  0x18   :  { %458 = shalt.err (!%p455_p9)
}
  0x19   :  { %37 = dma.hbm_to_vmem [thread:$0]  %s560_s1, 1024, %s32_s23, [#allocation6], %s508_s18, %s508_s18, %s509_s19  }
  0x1a   :  { %499 = dma.done.wait [#allocation3], 256  }
  0x1b   :  { %500 = vsyncadd [#allocation3], 4294967040 }
  0x1c   :  { %501 = dma.done.wait [#allocation6], 1024  }
  0x1d   :  { %502 = vsyncadd [#allocation6], 4294966272  ;;  %v401_v0 = vld [vmem:[#allocation5 + $0x38] sm:$0xff]   ;;  %v402_v1 = vld [vmem:[#allocation5 + $0x30] sm:$0xff]   ;;  %v511_v23 = vmov 0.0   ;;  %vm512_vm0 = vmmov 0  }
  0x1e   :  { %359 = vmatprep.subr.bf16.mxu0 %v401_v0  ;;  %v403_v2 = vld [vmem:[#allocation5 + $0x28] sm:$0xff]   ;;  %v404_v3 = vld [vmem:[#allocation5 + $0x20] sm:$0xff]   ;;  %v409_v4 = vld [vmem:[#allocation2] sm:$0xff]   ;;  %379 = vmatprep.subr.bf16.mxu1 %v511_v23 }
  0x1f   :  { %360 = vmatpush3.bf16.msra.mxu0 %v401_v0  ;;  %375 = vmatprep.mubr.bf16.mxu0 %v409_v4  ;;  %v405_v5 = vld [vmem:[#allocation5 + $0x18] sm:$0xff]   ;;  %v406_v6 = vld [vmem:[#allocation5 + $0x10] sm:$0xff]   ;;  %v407_v7 = vld [vmem:[#allocation5 + $0x8] sm:$0xff]  }
  0x20   :  { %361 = vmatprep.subr.bf16.mxu0 %v402_v1  ;;  %v408_v8 = vld [vmem:[#allocation5] sm:$0xff]   ;;  %v410_v9 = vld [vmem:[#allocation2 + $0x8] sm:$0xff]   ;;  %v334_v10 = vld [vmem:[%s561_s2] ss:$0 sm:$0xff]  ;;  %381 = vmatprep.mubr.msk.bf16.mxu1 %vm512_vm0, %v511_v23  ;;  %s513_s2 = smov [#allocation8]  }
  0x21   :  { %s317_s27 = sshll.u32 %s513_s2, 4  ;;  %s318_s27 = int_to_ptr.vmem [resolvable:$true] %s317_s27 }
  0x22   :  { %s459_s28 = scalar_lea.vmem %s318_s27, 512  ;;  %p464_p11 = scmp.lt.s32.totalorder %s318_s27, %s318_s27 }
  0x23   :  { %362 = vmatpush3.bf16.msra.mxu0 %v402_v1  ;;  %p460_p10 = scmp.ne.s32.totalorder %s318_s27, %s459_s28  ;;  %p465_p12 = scmp.lt.s32.totalorder %s459_s28, %s459_s28 }
  0x24   :  { %363 = vmatprep.subr.bf16.mxu0 %v403_v2 }
  0x25   :  { %p466_p13 = por %p465_p12, %p464_p11 }
  0x27   :  { %364 = vmatpush3.bf16.msra.mxu0 %v403_v2  ;;  %p467_p0 = pnand %p466_p13, %p460_p10 }
  0x28   :  { %365 = vmatprep.subr.bf16.mxu0 %v404_v3 }
  0x2b   :  { %366 = vmatpush3.bf16.msra.mxu0 %v404_v3 }
  0x2c   :  { %367 = vmatprep.subr.bf16.mxu0 %v405_v5 }
  0x2f   :  { %368 = vmatpush3.bf16.msra.mxu0 %v405_v5 }
  0x30   :  { %369 = vmatprep.subr.bf16.mxu0 %v406_v6 }
  0x33   :  { %370 = vmatpush3.bf16.msra.mxu0 %v406_v6 }
  0x34   :  { %371 = vmatprep.subr.bf16.mxu0 %v407_v7 }
  0x37   :  { %372 = vmatpush3.bf16.msra.mxu0 %v407_v7 }
  0x38   :  { %373 = vmatprep.subr.bf16.mxu0 %v408_v8 }
  0x3b   :  { %374 = vmatpush3.bf16.msra.mxu0 %v408_v8 }
  0x3e   :  { %376 = vmatmul.mubr.bf16.vlgmr.msra.gmra.mxu0 %v410_v9 }
  0xfe   :  { %v377_v11 = vpop.f32.mrf.mxu0 }
  0xff   :  { %v177_v12 = vadd.f32 %v377_v11, %v334_v10 }
 0x100   :  { %v168_v13 = vpop.f32.mrf.mxu0 }
 0x101   :  { %185 = vst [vmem:[#allocation8 + $0x10] sm:$0xff] %v177_v12  ;;  %v169_v14 = vadd.f32 %v334_v10, %v168_v13  ;;  %v189_v15 = vmul.f32 %v177_v12, %v177_v12 }
 0x102   :  { %v378_v16 = vpop.f32.mrf.mxu0 }
 0x103   :  { %183 = vst [vmem:[#allocation8] sm:$0xff] %v169_v14  ;;  %v180_v17 = vadd.f32 %v378_v16, %v334_v10  ;;  %195 = vadd.xlane.f32.xlu1 %v189_v15  ;;  %v187_v18 = vmul.f32 %v169_v14, %v169_v14 }
 0x104   :  { %v171_v19 = vpop.f32.mrf.mxu0 }
 0x105   :  { %186 = vst [vmem:[#allocation8 + $0x18] sm:$0xff] %v180_v17  ;;  %v172_v20 = vadd.f32 %v334_v10, %v171_v19  ;;  %191 = vadd.xlane.f32.xlu0 %v187_v18  ;;  %v190_v21 = vmul.f32 %v180_v17, %v180_v17 }
 0x107   :  { %184 = vst [vmem:[#allocation8 + $0x8] sm:$0xff] %v172_v20  ;;  %197 = vadd.xlane.f32.xlu1 %v190_v21  ;;  %v188_v22 = vmul.f32 %v172_v20, %v172_v20 }
 0x109   :  { %193 = vadd.xlane.f32.xlu0 %v188_v22 }
 0x18c   :  { %v196_v24 = vpop.xlane.xlu1 %195 }
 0x18d   :  { %v201_v31 = vmax.f32 %v196_v24, 1e-30 }
 0x18e   :  { %v192_v25 = vpop.xlane.xlu0 %191 }
 0x18f   :  { %v199_v26 = vmax.f32 %v192_v25, 1e-30 }
 0x190   :  { %v198_v27 = vpop.xlane.xlu1 %197 }
 0x191   :  { %411 = vrsqrt.f32 %v199_v26  ;;  %v202_v30 = vmax.f32 %v198_v27, 1e-30 }
 0x192   :  { %v194_v28 = vpop.xlane.xlu0 %193 }
 0x193   :  { %v200_v29 = vmax.f32 %v194_v28, 1e-30 }
 0x195   :  { %413 = vrsqrt.f32 %v200_v29 }
 0x196   :  { %415 = vrsqrt.f32 %v202_v30 }
 0x197   :  { %417 = vrsqrt.f32 %v201_v31 }
 0x19e   :  { %v412_v32 = vpop.eup %411 }
 0x19f   :  { %v207_v34 = vmul.f32 %v412_v32, %v169_v14 }
 0x1a2   :  { %v414_v33 = vpop.eup %413 }
 0x1a3   :  { %v208_v35 = vmul.f32 %v414_v33, %v172_v20  ;;  %v416_v37 = vpop.eup %415 }
 0x1a4   :  { %v418_v38 = vpop.eup %417  ;;  %v210_v39 = vmul.f32 %v416_v37, %v180_v17 }
 0x1a5   :  { %v211_v36 = vpack.c.bf16 %v208_v35, %v207_v34  ;;  %v209_v40 = vmul.f32 %v418_v38, %v177_v12 }
 0x1a7   :  { %380 = vmatpush3.bf16.xpose.msra.mxu1 %v211_v36  ;;  %v212_v41 = vpack.c.bf16 %v210_v39, %v209_v40 }
 0x1a8   :  { %385 = vmatprep.subr.bf16.mxu1 %v511_v23 }
 0x1ae   :  { %382 = vmatmul.mubr.bf16.vlgmr.msra.gmra.mxu1 %v211_v36 }
 0x1af   :  { %386 = vmatpush3.bf16.xpose.msra.mxu1 %v212_v41  ;;  %387 = vmatprep.mubr.msk.bf16.mxu1 %vm512_vm0, %v511_v23 }
 0x1b6   :  { %388 = vmatmul.mubr.bf16.vlgmr.msra.gmra.mxu1 %v212_v41 }
 0x1b7   :  { %470 = shalt.err (!%p467_p0)
}
 0x1b8   :  { %s514_s29 = smov 128   ;;  %s515_s30 = smov 8   ;;  %vm295_vm1 = vcmask 130048  }
 0x1b9   :  { %323 = dma.vmem_to_hbm [thread:$0]  %s318_s27, 512, %s563_s4, [#allocation9], %s514_s29, %s514_s29, %s515_s30  }
 0x1ba   :  { %s516_s7 = smov [#allocation7]  }
 0x1bb   :  { %s305_s8 = sshll.u32 %s516_s7, 4  ;;  %s306_s8 = int_to_ptr.vmem [resolvable:$true] %s305_s8 }
 0x1bc   :  { %s479_s9 = scalar_lea.vmem %s306_s8, 512  ;;  %p484_p2 = scmp.lt.s32.totalorder %s306_s8, %s306_s8 }
 0x1bd   :  { %p480_p1 = scmp.ne.s32.totalorder %s306_s8, %s479_s9  ;;  %p485_p3 = scmp.lt.s32.totalorder %s479_s9, %s479_s9 }
 0x1bf   :  { %p486_p4 = por %p485_p3, %p484_p2 }
 0x1c1   :  { %p487_p5 = pnand %p486_p4, %p480_p1 }
 0x26e   :  { %v247_v42 = vpop.f32.mrf.mxu1 }
 0x26f   :  { %296 = vst.msk [vmem:[#allocation7] sm:$0xff] %vm295_vm1, %v247_v42 }
 0x270   :  { %v383_v43 = vpop.f32.mrf.mxu1 }
 0x272   :  { %v250_v44 = vpop.f32.mrf.mxu1 }
 0x273   :  { %297 = vst.msk [vmem:[#allocation7 + $0x8] sm:$0xff] %vm295_vm1, %v250_v44 }
 0x274   :  { %v384_v45 = vpop.f32.mrf.mxu1 }
 0x276   :  { %v288_v46 = vpop.f32.mrf.mxu1 }
 0x277   :  { %298 = vst.msk [vmem:[#allocation7 + $0x10] sm:$0xff] %vm295_vm1, %v288_v46 }
 0x278   :  { %v389_v47 = vpop.f32.mrf.mxu1 }
 0x27a   :  { %v291_v48 = vpop.f32.mrf.mxu1 }
 0x27b   :  { %299 = vst.msk [vmem:[#allocation7 + $0x18] sm:$0xff] %vm295_vm1, %v291_v48 }
 0x27c   :  { %v390_v49 = vpop.f32.mrf.mxu1 }
 0x27d   :  { %490 = shalt.err (!%p487_p5)
}
 0x27e   :  { %311 = dma.vmem_to_hbm [thread:$0]  %s306_s8, 512, %s562_s3, [#allocation4], %s514_s29, %s514_s29, %s515_s30  }
 0x27f   :  { %503 = dma.done.wait [#allocation4], 512  }
 0x280   :  { %504 = vsyncadd [#allocation4], 4294966784 }
 0x281   :  { %505 = dma.done.wait [#allocation9], 512  }
 0x282   :  { %506 = vsyncadd [#allocation9], 4294966784 }
 0x283   :  { %330 = vsyncpa [#allocation3], 1 }
 0x284   :  { %331 = vsyncpa [#allocation6], 1 }
 0x285   :  { %332 = vsyncpa [#allocation4], 1 }
 0x286   :  { %333 = vsyncpa [#allocation9], 1 }

</bundles_post_ra>
